<compile_context>
chip_gen: v7x
topology: tpu7x:2x2x1
jax: 0.10.0
libtpu: 0.0.40
codegen_flags: <defaults>
</compile_context>

<pallas_src>
from collections import defaultdict

import jax
import jax.numpy as jnp
from jax.experimental import pallas as pl
from jax.experimental.pallas import tpu as pltpu

VOCAB = 100
HIDDEN = 32
NUM_CLASSES = 3      # neg, neu, pos
V_PAD = 128          # vocab padded to one lane tile
C_PAD = 128          # lane-dense padded class dim
SCORE_LANE = 3       # unused padded lane carrying the sentiment score
S_CHUNK = 128        # sequence chunk bounding the live one-hot intermediate


def _round_up(x, m):
    return (x + m - 1) // m * m


def _ent_sent_kernel(ids_ref, mask_ref, tw_ref, b_ref, out_ref):
    """Fused one-hot gather/pool -> (counts @ tw) -> softmax -> sentiment score."""
    bt, s = ids_ref.shape
    v_pad = tw_ref.shape[0]
    c_pad = out_ref.shape[1]

    ids = ids_ref[...].astype(jnp.int32)            # cast in-kernel (cheap VPU filler)
    mask_b = mask_ref[...] != 0                     # [bt, s] bool
    # 2D mask-apply BEFORE the one-hot: masked tokens become a sentinel that
    # matches no vocab lane, so no 3D mask broadcast/select is needed.
    ids_eff = jnp.where(mask_b, ids, -1)            # [bt, s]

    def chunk_counts(ids_chunk):
        s_c = ids_chunk.shape[1]
        iota_v = jax.lax.broadcasted_iota(jnp.int32, (bt, s_c, v_pad), 2)
        onehot = (ids_chunk[:, :, None] == iota_v).astype(jnp.float32)  # [bt, s_c, V_PAD]
        return jnp.sum(onehot, axis=1)                                  # [bt, V_PAD]

    if s <= S_CHUNK:
        counts = chunk_counts(ids_eff)
    else:
        # S is padded to a multiple of S_CHUNK in the wrapper (mask=0 on padding),
        # so each chunk is full-width and the live 3D intermediate stays bounded.
        n_chunks = s // S_CHUNK

        def body(c, acc):
            off = pl.multiple_of(c * S_CHUNK, S_CHUNK)
            return acc + chunk_counts(
                jax.lax.dynamic_slice_in_dim(ids_eff, off, S_CHUNK, axis=1))

        counts = jax.lax.fori_loop(0, n_chunks, body,
                                   jnp.zeros((bt, v_pad), jnp.float32),
                                   unroll=n_chunks <= 8)

    denom = jnp.maximum(jnp.sum(mask_b.astype(jnp.float32), axis=1, keepdims=True), 1.0)
    inv_denom = pl.reciprocal(denom, approx=False)                      # [bt, 1]

    # Folded matmul: pooled @ w == (counts @ (table @ w)) * inv_denom.
    # bf16 MXU feed; counts (integer token counts <= s) are exact in bf16 for s <= 256.
    if s <= 256:
        contrib = jnp.dot(counts.astype(jnp.bfloat16), tw_ref[...],
                          preferred_element_type=jnp.float32)
    else:
        contrib = jnp.dot(counts, tw_ref[...].astype(jnp.float32),
                          preferred_element_type=jnp.float32)
    logits = contrib * inv_denom + b_ref[...]                           # [bt, C_PAD]

    # softmax over the class dim (padded classes carry bias -1e9 -> prob ~0)
    m = jnp.max(logits, axis=-1, keepdims=True)
    e = jnp.exp(logits - m)
    probs = e * pl.reciprocal(jnp.sum(e, axis=-1, keepdims=True), approx=True)

    # neg, neu, pos = probs.unbind(-1); sent_score = pos / (pos + neg)
    neg = probs[:, 0:1]
    pos = probs[:, 2:3]
    # exact reciprocal + clamp: pos+neg can underflow when the neutral class dominates
    score = pos * pl.reciprocal(jnp.maximum(pos + neg, 1e-20), approx=False)

    # Single lane-dense output: lanes 0..2 = class probs, lane SCORE_LANE = score.
    lane = jax.lax.broadcasted_iota(jnp.int32, (bt, c_pad), 1)
    out_ref[...] = jnp.where(lane == SCORE_LANE, score, probs)


def make_params(key):
    """Returns (kernel_params, ref_params)."""
    k_emb, k_w, k_b = jax.random.split(key, 3)
    emb_table = jax.random.normal(k_emb, (VOCAB, HIDDEN), jnp.float32) * 0.02
    w = jax.random.normal(k_w, (HIDDEN, NUM_CLASSES), jnp.float32) * 0.1
    b = jax.random.normal(k_b, (NUM_CLASSES,), jnp.float32) * 0.1

    # Fold embedding @ classifier once: tw[v, c] = sum_h table[v, h] * w[h, c].
    table_pad = jnp.zeros((V_PAD, HIDDEN), jnp.float32).at[:VOCAB].set(emb_table)
    w_pad = jnp.zeros((HIDDEN, C_PAD), jnp.float32).at[:, :NUM_CLASSES].set(w)
    tw = (table_pad @ w_pad).astype(jnp.bfloat16)                       # [V_PAD, C_PAD]
    b_pad = jnp.full((1, C_PAD), -1e9, jnp.float32).at[0, :NUM_CLASSES].set(b)
    return (tw, b_pad), (emb_table, w, b)


@jax.jit
def entity_sent_forward(input_ids, attention_mask, params):
    """Returns (probabilities [B, 3], sent_score [B])."""
    tw, b = params
    B, S = input_ids.shape

    # Bound the in-kernel one-hot intermediate: pad long sequences to a multiple
    # of S_CHUNK (mask=0 padding contributes nothing).
    if S > S_CHUNK and S % S_CHUNK != 0:
        s_new = _round_up(S, S_CHUNK)
        input_ids = jnp.pad(input_ids, ((0, 0), (0, s_new - S)))
        attention_mask = jnp.pad(attention_mask, ((0, 0), (0, s_new - S)))
        S = s_new

    # Batch-tile selection: amortize per-step overhead, cap by an ~8 MiB budget
    # for the live [bt, s_chunk, 128] f32 one-hot (safe on v5e 16 MiB default
    # scoped / v7x 64 MiB physical VMEM), and give v7x's two TensorCores at
    # least two parallel grid steps when the batch allows it.
    s_chunk = min(S, S_CHUNK)
    vmem_budget = 8 << 20
    bt_cap = max(8, min(1024, (vmem_budget // (s_chunk * V_PAD * 4)) // 8 * 8))
    if B <= 16:
        bt = min(bt_cap, _round_up(B, 8))
    else:
        bt = min(bt_cap, _round_up(pl.cdiv(B, 2), 8))
    B_pad = _round_up(B, bt)
    if B_pad != B:
        # Padded rows (all-zero mask) produce harmless finite values; sliced off below.
        input_ids = jnp.pad(input_ids, ((0, B_pad - B), (0, 0)))
        attention_mask = jnp.pad(attention_mask, ((0, B_pad - B), (0, 0)))

    out = pl.pallas_call(
        _ent_sent_kernel,
        out_shape=jax.ShapeDtypeStruct((B_pad, C_PAD), jnp.float32),
        grid=(B_pad // bt,),
        in_specs=[
            pl.BlockSpec((bt, S), lambda i: (i, 0)),            # input_ids (native dtype)
            pl.BlockSpec((bt, S), lambda i: (i, 0)),            # attention_mask (native dtype)
            pl.BlockSpec((V_PAD, C_PAD), lambda i: (0, 0)),     # folded table@weight (bf16)
            pl.BlockSpec((1, C_PAD), lambda i: (0, 0)),         # padded classifier bias
        ],
        out_specs=pl.BlockSpec((bt, C_PAD), lambda i: (i, 0)),
        compiler_params=pltpu.CompilerParams(
            dimension_semantics=("parallel",),
            vmem_limit_bytes=32 << 20),
    )(input_ids, attention_mask, tw, b)

    probs = out[:B, :NUM_CLASSES]
    sent_score = out[:B, SCORE_LANE]
    return probs, sent_score


def reference_forward(input_ids, attention_mask, ref_params):
    """Pure-JAX reference of the same forward pass (for validation)."""
    emb_table, w, b = ref_params
    embeds = jnp.take(emb_table, input_ids, axis=0)                   # [B, S, H]
    mask = attention_mask.astype(jnp.float32)
    denom = jnp.maximum(jnp.sum(mask, axis=1, keepdims=True), 1.0)
    pooled = jnp.sum(embeds * mask[:, :, None], axis=1) / denom       # [B, H]
    logits = pooled @ w + b                                           # [B, 3]
    probs = jax.nn.softmax(logits, axis=-1)
    score = probs[:, 2] / (probs[:, 2] + probs[:, 0])
    return probs, score


class EntitySentModelJax:
    """Python-side equivalent of EntitySentModel (dict bookkeeping is host glue)."""

    def __init__(self, params):
        self.params = params
        self.ent_sent = defaultdict(dict)

    def forward(self, batch):
        input_ids = batch["context"]["input_ids"]
        attention_mask = batch["context"]["attention_mask"]
        probs, sent_score = entity_sent_forward(input_ids, attention_mask,
                                                self.params)
        # single device->host transfer, then iterate host values
        # TODO(synk): ent_sent dict bookkeeping stays on the host (no Pallas equivalent).
        scores_host = jax.device_get(sent_score)
        for i, score in enumerate(scores_host):
            if len(batch["entity"][i]) != 0:
                for entity in batch["entity"][i]:
                    self.ent_sent[batch["conv_id"][i]][entity] = float(score)
        return probs, sent_score


if __name__ == "__main__":
    key = jax.random.PRNGKey(0)
    k_params, k_ids = jax.random.split(key)

    B, S = 8, 8
    kernel_params, ref_params = make_params(k_params)

    input_ids = jax.random.randint(k_ids, (B, S), 0, VOCAB, dtype=jnp.int32)
    attention_mask = jnp.ones((B, S), jnp.int32).at[:, 6:].set(0)  # pad last 2 tokens

    batch = {
        "context": {"input_ids": input_ids, "attention_mask": attention_mask},
        "entity": [["movie_a"], [], ["movie_b", "movie_c"], [], [], ["movie_d"], [], []],
        "conv_id": [0, 0, 1, 1, 2, 2, 3, 3],
    }

    model = EntitySentModelJax(kernel_params)
    probs, sent_score = model.forward(batch)
    jax.block_until_ready((probs, sent_score))

    # shape / sanity checks + loose numeric check against pure-JAX f32 reference
    # (tolerance absorbs approx EUP softmax reciprocal + bf16 folded weights)
    probs_ref, score_ref = reference_forward(input_ids, attention_mask, ref_params)
    assert probs.shape == (B, NUM_CLASSES)
    assert sent_score.shape == (B,)
    assert bool(jnp.all(jnp.isfinite(probs)))
    assert bool(jnp.all(jnp.isfinite(sent_score)))
    assert float(jnp.max(jnp.abs(probs - probs_ref))) < 2e-2
    assert float(jnp.max(jnp.abs(sent_score - score_ref))) < 2e-2
    print("KERNEL_OK")
</pallas_src>

<mosaic_0001>
module attributes {stable_mosaic.version = 11 : i64} {
  func.func @_ent_sent_kernel(%arg0: i32, %arg1: memref<8x8xi32, #tpu.memory_space<vmem>>, %arg2: memref<8x8xi32, #tpu.memory_space<vmem>>, %arg3: memref<128x128xbf16, #tpu.memory_space<vmem>>, %arg4: memref<1x128xf32, #tpu.memory_space<vmem>>, %arg5: memref<8x128xf32, #tpu.memory_space<vmem>>) attributes {dimension_semantics = [#tpu.dimension_semantics<parallel>], iteration_bounds = array<i64: 1>, scalar_prefetch = 0 : i64, scratch_operands = 0 : i64, tpu.core_type = #tpu.core_type<tc>, window_params = [{transform_indices = @transform_0, window_bounds = array<i64: 8, 8>}, {transform_indices = @transform_1, window_bounds = array<i64: 8, 8>}, {pipeline_mode = #tpu.pipeline_mode<synchronous>, transform_indices = @transform_2, window_bounds = array<i64: 128, 128>}, {pipeline_mode = #tpu.pipeline_mode<synchronous>, transform_indices = @transform_3, window_bounds = array<i64: 1, 128>}, {transform_indices = @transform_4, window_bounds = array<i64: 8, 128>}]} {
    %c0 = arith.constant 0 : index
    %c0_0 = arith.constant 0 : index
    %0 = vector.load %arg1[%c0, %c0_0] : memref<8x8xi32, #tpu.memory_space<vmem>>, vector<8x8xi32>
    %c0_1 = arith.constant 0 : index
    %c0_2 = arith.constant 0 : index
    %1 = vector.load %arg2[%c0_1, %c0_2] : memref<8x8xi32, #tpu.memory_space<vmem>>, vector<8x8xi32>
    %c0_i32 = arith.constant 0 : i32
    %2 = vector.broadcast %c0_i32 : i32 to vector<8x8xi32>
    %3 = arith.cmpi ne, %1, %2 : vector<8x8xi32>
    %c-1_i32 = arith.constant -1 : i32
    %4 = vector.broadcast %c-1_i32 : i32 to vector<8x8xi32>
    %5 = arith.select %3, %0, %4 : vector<8x8xi1>, vector<8x8xi32>
    %6 = tpu.iota {dimensions = array<i32: 2>} : vector<8x8x128xi32>
    %7 = vector.shape_cast %5 : vector<8x8xi32> to vector<8x8x1xi32>
    %8 = vector.broadcast %7 : vector<8x8x1xi32> to vector<8x8x128xi32>
    %9 = arith.cmpi eq, %8, %6 : vector<8x8x128xi32>
    %10 = arith.extui %9 : vector<8x8x128xi1> to vector<8x8x128xi32>
    %11 = arith.sitofp %10 : vector<8x8x128xi32> to vector<8x8x128xf32>
    %cst = arith.constant dense<0.000000e+00> : vector<8x128xf32>
    %12 = vector.multi_reduction <add>, %11, %cst [1] : vector<8x8x128xf32> to vector<8x128xf32>
    %13 = arith.extui %3 : vector<8x8xi1> to vector<8x8xi32>
    %14 = arith.sitofp %13 : vector<8x8xi32> to vector<8x8xf32>
    %cst_3 = arith.constant dense<0.000000e+00> : vector<8xf32>
    %15 = vector.multi_reduction <add>, %14, %cst_3 [1] : vector<8x8xf32> to vector<8xf32>
    %16 = vector.shape_cast %15 : vector<8xf32> to vector<8x1xf32>
    %cst_4 = arith.constant 1.000000e+00 : f32
    %17 = vector.broadcast %cst_4 : f32 to vector<8x1xf32>
    %18 = arith.maximumf %16, %17 : vector<8x1xf32>
    %19 = tpu.reciprocal %18 : vector<8x1xf32> -> vector<8x1xf32>
    %20 = arith.truncf %12 : vector<8x128xf32> to vector<8x128xbf16>
    %c0_5 = arith.constant 0 : index
    %c0_6 = arith.constant 0 : index
    %21 = vector.load %arg3[%c0_5, %c0_6] : memref<128x128xbf16, #tpu.memory_space<vmem>>, vector<128x128xbf16>
    %cst_7 = arith.constant dense<0.000000e+00> : vector<8x128xf32>
    %22 = tpu.matmul %20, %21, %cst_7 {dimension_numbers = #tpu.dot_dimension_numbers<[1], [0], [0], [1], [0, 0, 1, 1], [], []>} : vector<8x128xbf16>, vector<128x128xbf16>, vector<8x128xf32> -> vector<8x128xf32>
    %23 = vector.broadcast %19 : vector<8x1xf32> to vector<8x128xf32>
    %24 = arith.mulf %22, %23 : vector<8x128xf32>
    %c0_8 = arith.constant 0 : index
    %c0_9 = arith.constant 0 : index
    %25 = vector.load %arg4[%c0_8, %c0_9] : memref<1x128xf32, #tpu.memory_space<vmem>>, vector<1x128xf32>
    %26 = vector.broadcast %25 : vector<1x128xf32> to vector<8x128xf32>
    %27 = arith.addf %24, %26 : vector<8x128xf32>
    %cst_10 = arith.constant dense<0xFF800000> : vector<8xf32>
    %28 = vector.multi_reduction <maximumf>, %27, %cst_10 [1] : vector<8x128xf32> to vector<8xf32>
    %29 = vector.shape_cast %28 : vector<8xf32> to vector<8x1xf32>
    %30 = vector.broadcast %29 : vector<8x1xf32> to vector<8x128xf32>
    %31 = arith.subf %27, %30 : vector<8x128xf32>
    %32 = math.exp %31 : vector<8x128xf32>
    %cst_11 = arith.constant dense<0.000000e+00> : vector<8xf32>
    %33 = vector.multi_reduction <add>, %32, %cst_11 [1] : vector<8x128xf32> to vector<8xf32>
    %34 = vector.shape_cast %33 : vector<8xf32> to vector<8x1xf32>
    %35 = tpu.reciprocal %34 {approx = true} : vector<8x1xf32> -> vector<8x1xf32>
    %36 = vector.broadcast %35 : vector<8x1xf32> to vector<8x128xf32>
    %37 = arith.mulf %32, %36 : vector<8x128xf32>
    %38 = vector.extract_strided_slice %37 {offsets = [0, 0], sizes = [8, 1], strides = [1, 1]} : vector<8x128xf32> to vector<8x1xf32>
    %39 = vector.extract_strided_slice %37 {offsets = [0, 2], sizes = [8, 1], strides = [1, 1]} : vector<8x128xf32> to vector<8x1xf32>
    %40 = arith.addf %39, %38 : vector<8x1xf32>
    %cst_12 = arith.constant 9.99999968E-21 : f32
    %41 = vector.broadcast %cst_12 : f32 to vector<8x1xf32>
    %42 = arith.maximumf %40, %41 : vector<8x1xf32>
    %43 = tpu.reciprocal %42 : vector<8x1xf32> -> vector<8x1xf32>
    %44 = arith.mulf %39, %43 : vector<8x1xf32>
    %45 = tpu.iota {dimensions = array<i32: 1>} : vector<8x128xi32>
    %c3_i32 = arith.constant 3 : i32
    %46 = vector.broadcast %c3_i32 : i32 to vector<8x128xi32>
    %47 = arith.cmpi eq, %45, %46 : vector<8x128xi32>
    %48 = vector.shape_cast %44 : vector<8x1xf32> to vector<8x1xf32>
    %49 = vector.broadcast %48 : vector<8x1xf32> to vector<8x128xf32>
    %50 = arith.select %47, %49, %37 : vector<8x128xi1>, vector<8x128xf32>
    %c0_13 = arith.constant 0 : index
    %c0_14 = arith.constant 0 : index
    %51 = vector.load %arg5[%c0_13, %c0_14] : memref<8x128xf32, #tpu.memory_space<vmem>>, vector<8x128xf32>
    tpu.vector_store %arg5[%c0_13, %c0_14], %50 {strides = array<i32>} : memref<8x128xf32, #tpu.memory_space<vmem>>, vector<8x128xf32>,
    return
  }
  func.func @transform_0(%arg0: i32) -> (i32, i32) {
    %c0_i32 = arith.constant 0 : i32
    %c0_i32_0 = arith.constant 0 : i32
    return %arg0, %c0_i32 : i32, i32
  }
  func.func @transform_1(%arg0: i32) -> (i32, i32) {
    %c0_i32 = arith.constant 0 : i32
    %c0_i32_0 = arith.constant 0 : i32
    return %arg0, %c0_i32 : i32, i32
  }
  func.func @transform_2(%arg0: i32) -> (i32, i32) {
    %c0_i32 = arith.constant 0 : i32
    %c0_i32_0 = arith.constant 0 : i32
    %c0_i32_1 = arith.constant 0 : i32
    return %c0_i32, %c0_i32_0 : i32, i32
  }
  func.func @transform_3(%arg0: i32) -> (i32, i32) {
    %c0_i32 = arith.constant 0 : i32
    %c0_i32_0 = arith.constant 0 : i32
    %c0_i32_1 = arith.constant 0 : i32
    return %c0_i32, %c0_i32_0 : i32, i32
  }
  func.func @transform_4(%arg0: i32) -> (i32, i32) {
    %c0_i32 = arith.constant 0 : i32
    %c0_i32_0 = arith.constant 0 : i32
    return %arg0, %c0_i32 : i32, i32
  }
}

</mosaic_0001>

<bundles_post_ra>
// kernel: entity_sent_forward.1
= control target key start
LH: loop header
LB: loop body
LE: loop exit
PB: predicated region body
PF: predicated region fallthrough
CT: control target
= control target key end

     0   :  { %9 = vsyncpa [#allocation3], 0  ;;  %s632_s0 = inlined_call_operand.hbm [shape: s32[8,8], index: 0, kind: input, shape index: {}]   ;;  %s633_s1 = inlined_call_operand.hbm [shape: s32[8,8], index: 1, kind: input, shape index: {}]   ;;  %s634_s2 = inlined_call_operand.hbm [shape: bf16[128,128], index: 2, kind: input, shape index: {}]   ;;  %s635_s3 = inlined_call_operand.vmem [shape: f32[1,128], index: 3, kind: input, shape index: {}]   ;;  %s636_s4 = inlined_call_operand.vmem [shape: f32[8,128], index: 4, kind: output, shape index: {}]  }
   0x1   :  { %10 = vsyncpa [#allocation5], 0  ;;  %s525_s15 = smov [#allocation4]   ;;  %s526_s17 = smov [#allocation2]  }
   0x2   :  { %s27_s16 = sshll.u32 %s525_s15, 4  ;;  %s17_s18 = sshll.u32 %s526_s17, 4  ;;  %s28_s16 = int_to_ptr.vmem [resolvable:$true] %s27_s16  ;;  %s18_s18 = int_to_ptr.vmem [resolvable:$true] %s17_s18 }
   0x3   :  { %s455_s21 = scalar_lea.hbm %s633_s1, 128 }
   0x4   :  { %p456_p0 = scmp.ne.s32.totalorder %s633_s1, %s455_s21  ;;  %p459_p1 = scmp.lt.u32.totalorder %s455_s21, %s633_s1 }
   0x6   :  { %p461_p2 = pnand %p459_p1, %p456_p0 }
   0x8   :  { %464 = shalt.err (!%p461_p2)
}
   0x9   :  { %s465_s26 = scalar_lea.vmem %s28_s16, 128  ;;  %p470_p4 = scmp.lt.s32.totalorder %s28_s16, %s28_s16 }
   0xa   :  { %p466_p3 = scmp.ne.s32.totalorder %s28_s16, %s465_s26  ;;  %p471_p5 = scmp.lt.s32.totalorder %s465_s26, %s465_s26 }
   0xc   :  { %p472_p6 = por %p471_p5, %p470_p4 }
   0xe   :  { %p473_p7 = pnand %p472_p6, %p466_p3 }
  0x10   :  { %476 = shalt.err (!%p473_p7)
}
  0x11   :  { %30 = dma.hbm_to_vmem [thread:$0]  %s633_s1, 128, %s28_s16, [#allocation5]  }
  0x12   :  { %s477_s5 = scalar_lea.hbm %s632_s0, 128 }
  0x13   :  { %p478_p8 = scmp.ne.s32.totalorder %s632_s0, %s477_s5  ;;  %p481_p9 = scmp.lt.u32.totalorder %s477_s5, %s632_s0 }
  0x15   :  { %p483_p10 = pnand %p481_p9, %p478_p8 }
  0x17   :  { %486 = shalt.err (!%p483_p10)
}
  0x18   :  { %s487_s10 = scalar_lea.vmem %s18_s18, 128  ;;  %p492_p12 = scmp.lt.s32.totalorder %s18_s18, %s18_s18 }
  0x19   :  { %p488_p11 = scmp.ne.s32.totalorder %s18_s18, %s487_s10  ;;  %p493_p13 = scmp.lt.s32.totalorder %s487_s10, %s487_s10 }
  0x1b   :  { %p494_p0 = por %p493_p13, %p492_p12 }
  0x1d   :  { %p495_p1 = pnand %p494_p0, %p488_p11 }
  0x1f   :  { %498 = shalt.err (!%p495_p1)
}
  0x20   :  { %20 = dma.hbm_to_vmem [thread:$0]  %s632_s0, 128, %s18_s18, [#allocation3]  }
  0x21   :  { %s527_s12 = smov [#allocation6]   ;;  %s499_s16 = scalar_lea.hbm %s634_s2, 1024 }
  0x22   :  { %s36_s13 = sshll.u32 %s527_s12, 4  ;;  %p500_p2 = scmp.ne.s32.totalorder %s634_s2, %s499_s16  ;;  %s37_s13 = int_to_ptr.vmem [resolvable:$true] %s36_s13 }
  0x23   :  { %p503_p3 = scmp.lt.u32.totalorder %s499_s16, %s634_s2 }
  0x25   :  { %p505_p4 = pnand %p503_p3, %p500_p2 }
  0x27   :  { %508 = shalt.err (!%p505_p4)
}
  0x28   :  { %s509_s22 = scalar_lea.vmem %s37_s13, 1024  ;;  %p514_p6 = scmp.lt.s32.totalorder %s37_s13, %s37_s13 }
  0x29   :  { %p510_p5 = scmp.ne.s32.totalorder %s37_s13, %s509_s22  ;;  %p515_p7 = scmp.lt.s32.totalorder %s509_s22, %s509_s22 }
  0x2b   :  { %p516_p8 = por %p515_p7, %p514_p6 }
  0x2d   :  { %p517_p9 = pnand %p516_p8, %p510_p5 }
  0x2f   :  { %520 = shalt.err (!%p517_p9)
}
  0x30   :  { %s528_s0 = smov 64   ;;  %s529_s18 = smov 4  }
  0x31   :  { %42 = dma.hbm_to_vmem [thread:$0]  %s634_s2, 1024, %s37_s13, [#allocation5], %s528_s0, %s528_s0, %s529_s18  }
  0x32   :  { %521 = dma.done.wait [#allocation3], 128  }
  0x33   :  { %522 = vsyncadd [#allocation3], 4294967168 }
  0x34   :  { %523 = dma.done.wait [#allocation5], 1152  }
  0x35   :  { %524 = vsyncadd [#allocation5], 4294966144  ;;  %v59_v0 = vlaneseq  ;;  %v530_v1 = vmov 0.0   ;;  %v55_v5 = vld [vmem:[#allocation2] sm:$0xff]  ;;  %v56_v6 = vld [vmem:[#allocation4] sm:$0xff]  ;;  %vm531_vm1 = vmmov 0  }
  0x36   :  { %408 = vmatprep.subr.bf16.mxu0 %v530_v1  ;;  %vm57_vm0 = vcmp.ne.s32.totalorder %v56_v6, 0  ;;  %v439_v9 = vld [vmem:[#allocation6] sm:$0xff]   ;;  %v440_v11 = vld [vmem:[#allocation6 + $0x8] sm:$0xff]   ;;  %v441_v18 = vld [vmem:[#allocation6 + $0x10] sm:$0xff]   ;;  %424 = vmatprep.mubr.msk.bf16.mxu0 %vm531_vm1, %v530_v1  ;;  %vm191_vm2 = vcmask 64512   ;;  %vm237_vm11 = vcmask 1041409  }
  0x37   :  { %v62_v2 = vshrl.u32 %v59_v0, 7  ;;  %v58_v10 = vsel %vm57_vm0, %v55_v5, 4294967295  ;;  %409 = vmatpush3.bf16.msra.mxu0 %v439_v9  ;;  %v442_v23 = vld [vmem:[#allocation6 + $0x18] sm:$0xff]   ;;  %v443_v26 = vld [vmem:[#allocation6 + $0x20] sm:$0xff]   ;;  %v444_v27 = vld [vmem:[#allocation6 + $0x28] sm:$0xff]   ;;  %v389_v30 = vsel %vm57_vm0, 1.0, %v530_v1 }
  0x38   :  { %410 = vmatprep.subr.bf16.mxu0 %v530_v1  ;;  %v445_v28 = vld [vmem:[#allocation6 + $0x30] sm:$0xff]   ;;  %v446_v29 = vld [vmem:[#allocation6 + $0x38] sm:$0xff]   ;;  %v192_v31 = vsel %vm191_vm2, %v389_v30, 0.0  ;;  %v607_v32 = vand.u32 127, %v59_v0  ;;  %vm239_vm12 = vcmask 1042434   ;;  %vm241_vm13 = vcmask 1043459  }
  0x39   :  { %v77_v3 = vsub.s32 2, %v62_v2  ;;  %v63_v4 = vsub.s32 0, %v62_v2  ;;  %v84_v7 = vsub.s32 3, %v62_v2  ;;  %v70_v8 = vsub.s32 1, %v62_v2 }
  0x3a   :  { %v98_v14 = vsub.s32 5, %v62_v2  ;;  %v91_v15 = vsub.s32 4, %v62_v2  ;;  %v112_v21 = vsub.s32 7, %v62_v2  ;;  %v105_v22 = vsub.s32 6, %v62_v2 }
  0x3b   :  { %v78_v12 = vrot.slane %v58_v10, %v77_v3  ;;  %v64_v13 = vrot.slane %v58_v10, %v63_v4  ;;  %v85_v16 = vrot.slane %v58_v10, %v84_v7  ;;  %v71_v17 = vrot.slane %v58_v10, %v70_v8  ;;  %411 = vmatpush3.bf16.msra.mxu0 %v440_v11 }
  0x3c   :  { %412 = vmatprep.subr.bf16.mxu0 %v530_v1  ;;  %v99_v19 = vrot.slane %v58_v10, %v98_v14  ;;  %v92_v20 = vrot.slane %v58_v10, %v91_v15  ;;  %v113_v24 = vrot.slane %v58_v10, %v112_v21  ;;  %v106_v25 = vrot.slane %v58_v10, %v105_v22 }
  0x3d   :  { %80 = vbcast.lane.b32.xlu1 %v78_v12, 256  ;;  %66 = vbcast.lane.b32.xlu0 %v64_v13, 256  ;;  %vm243_vm14 = vcmask 1044484   ;;  %vm245_vm15 = vcmask 1045509   ;;  %vm247_vm0 = vcmask 1046534   ;;  %vm249_vm1 = vcmask 1047559  }
  0x3e   :  { %vm367_vm2 = vcmp.eq.s32.totalorder %v607_v32, 3 }
  0x3f   :  { %413 = vmatpush3.bf16.msra.mxu0 %v441_v18 }
  0x40   :  { %414 = vmatprep.subr.bf16.mxu0 %v530_v1 }
  0x41   :  { %87 = vbcast.lane.b32.xlu1 %v85_v16, 256  ;;  %73 = vbcast.lane.b32.xlu0 %v71_v17, 256 }
  0x43   :  { %415 = vmatpush3.bf16.msra.mxu0 %v442_v23 }
  0x44   :  { %416 = vmatprep.subr.bf16.mxu0 %v530_v1 }
  0x45   :  { %101 = vbcast.lane.b32.xlu1 %v99_v19, 256  ;;  %94 = vbcast.lane.b32.xlu0 %v92_v20, 256 }
  0x47   :  { %417 = vmatpush3.bf16.msra.mxu0 %v443_v26 }
  0x48   :  { %418 = vmatprep.subr.bf16.mxu0 %v530_v1 }
  0x49   :  { %115 = vbcast.lane.b32.xlu1 %v113_v24, 256  ;;  %108 = vbcast.lane.b32.xlu0 %v106_v25, 256 }
  0x4b   :  { %419 = vmatpush3.bf16.msra.mxu0 %v444_v27 }
  0x4c   :  { %420 = vmatprep.subr.bf16.mxu0 %v530_v1 }
  0x4f   :  { %421 = vmatpush3.bf16.msra.mxu0 %v445_v28 }
  0x50   :  { %422 = vmatprep.subr.bf16.mxu0 %v530_v1 }
  0x53   :  { %423 = vmatpush3.bf16.msra.mxu0 %v446_v29 }
  0x68   :  { %193 = vadd.xlane.f32.xlu0 %v192_v31 }
  0xaf   :  { %v81_v33 = vpop.permute.xlu1 %80  ;;  %v67_v34 = vpop.permute.xlu0 %66 }
  0xb0   :  { %vm119_vm3 = vcmp.eq.s32.totalorder %v81_v33, %v607_v32  ;;  %vm117_vm4 = vcmp.eq.s32.totalorder %v67_v34, %v607_v32 }
  0xb1   :  { %v383_v35 = vsel %vm119_vm3, 1.0, %v530_v1  ;;  %v381_v36 = vsel %vm117_vm4, 1.0, %v530_v1 }
  0xb2   :  { %v153_v37 = vrot.slane %v383_v35, 4  ;;  %v141_v38 = vrot.slane %v381_v36, 4 }
  0xb3   :  { %v88_v39 = vpop.permute.xlu1 %87  ;;  %v74_v40 = vpop.permute.xlu0 %73 }
  0xb4   :  { %v154_v41 = vadd.f32 %v383_v35, %v153_v37  ;;  %v142_v42 = vadd.f32 %v381_v36, %v141_v38  ;;  %vm120_vm5 = vcmp.eq.s32.totalorder %v88_v39, %v607_v32  ;;  %vm118_vm6 = vcmp.eq.s32.totalorder %v74_v40, %v607_v32 }
  0xb5   :  { %v384_v43 = vsel %vm120_vm5, 1.0, %v530_v1  ;;  %v382_v44 = vsel %vm118_vm6, 1.0, %v530_v1 }
  0xb6   :  { %v155_v45 = vrot.slane %v154_v41, 2  ;;  %v143_v46 = vrot.slane %v142_v42, 2  ;;  %v159_v47 = vrot.slane %v384_v43, 4  ;;  %v147_v48 = vrot.slane %v382_v44, 4 }
  0xb7   :  { %v102_v49 = vpop.permute.xlu1 %101  ;;  %v95_v50 = vpop.permute.xlu0 %94 }
  0xb8   :  { %v156_v51 = vadd.f32 %v155_v45, %v154_v41  ;;  %v144_v52 = vadd.f32 %v143_v46, %v142_v42  ;;  %v160_v53 = vadd.f32 %v384_v43, %v159_v47  ;;  %v148_v54 = vadd.f32 %v382_v44, %v147_v48 }
  0xb9   :  { %vm122_vm7 = vcmp.eq.s32.totalorder %v102_v49, %v607_v32  ;;  %vm121_vm8 = vcmp.eq.s32.totalorder %v95_v50, %v607_v32 }
  0xba   :  { %v157_v55 = vrot.slane %v156_v51, 1  ;;  %v145_v56 = vrot.slane %v144_v52, 1  ;;  %v161_v57 = vrot.slane %v160_v53, 2  ;;  %v149_v58 = vrot.slane %v148_v54, 2 }
  0xbb   :  { %v386_v59 = vsel %vm122_vm7, 1.0, %v530_v1  ;;  %v385_v60 = vsel %vm121_vm8, 1.0, %v530_v1  ;;  %v116_v61 = vpop.permute.xlu1 %115  ;;  %v109_v62 = vpop.permute.xlu0 %108 }
  0xbc   :  { %v146_v63 = vadd.f32 %v145_v56, %v144_v52  ;;  %v162_v0 = vadd.f32 %v161_v57, %v160_v53  ;;  %v150_v2 = vadd.f32 %v149_v58, %v148_v54  ;;  %v171_v3 = vrot.slane %v386_v59, 4 }
  0xbd   :  { %v165_v4 = vrot.slane %v385_v60, 4  ;;  %vm124_vm9 = vcmp.eq.s32.totalorder %v116_v61, %v607_v32  ;;  %vm123_vm10 = vcmp.eq.s32.totalorder %v109_v62, %v607_v32  ;;  %v158_v5 = vadd.f32 %v157_v55, %v156_v51  ;;  %v398_v62 = vld [vmem:[%s635_s3] ss:$0 sm:$0xff]  ;;  %s533_s3 = smov 2  }
  0xbe   :  { %v163_v6 = vrot.slane %v162_v0, 1  ;;  %v151_v7 = vrot.slane %v150_v2, 1  ;;  %v172_v8 = vadd.f32 %v386_v59, %v171_v3  ;;  %v388_v10 = vsel %vm124_vm9, 1.0, %v530_v1 }
  0xbf   :  { %v166_v9 = vadd.f32 %v385_v60, %v165_v4  ;;  %v387_v11 = vsel %vm123_vm10, 1.0, %v530_v1  ;;  %v197_v12 = vpack.c.bf16 %v146_v63, %v146_v63  ;;  %v183_v17 = vrot.slane %v388_v10, 4 }
  0xc0   :  { %v164_v13 = vadd.f32 %v163_v6, %v162_v0  ;;  %v152_v14 = vadd.f32 %v151_v7, %v150_v2  ;;  %v173_v15 = vrot.slane %v172_v8, 2  ;;  %v177_v18 = vrot.slane %v387_v11, 4 }
  0xc1   :  { %v167_v16 = vrot.slane %v166_v9, 2  ;;  %v199_v19 = vpack.c.bf16 %v158_v5, %v158_v5  ;;  %v184_v23 = vadd.f32 %v388_v10, %v183_v17  ;;  %v229_v25 = vunpack.c.l.b16 %v197_v12 }
  0xc2   :  { %v198_v20 = vpack.c.bf16 %v152_v14, %v152_v14  ;;  %v174_v21 = vadd.f32 %v173_v15, %v172_v8  ;;  %v178_v24 = vadd.f32 %v387_v11, %v177_v18  ;;  %v200_v26 = vpack.c.bf16 %v164_v13, %v164_v13 }
  0xc3   :  { %v168_v22 = vadd.f32 %v167_v16, %v166_v9  ;;  %v185_v29 = vrot.slane %v184_v23, 2  ;;  %v231_v31 = vunpack.c.l.b16 %v199_v19  ;;  %v532_v10 = vmov 2  }
  0xc4   :  { %v230_v27 = vunpack.c.l.b16 %v198_v20  ;;  %v175_v28 = vrot.slane %v174_v21, 1  ;;  %v179_v30 = vrot.slane %v178_v24, 2  ;;  %v232_v39 = vunpack.c.l.b16 %v200_v26  ;;  %437 = vset.pattern.permute.xlu1 %v532_v10  ;;  %438 = vset.pattern.permute.xlu0 %v532_v10 }
  0xc5   :  { %v169_v1 = vrot.slane %v168_v22, 1  ;;  %v186_v36 = vadd.f32 %v185_v29, %v184_v23 }
  0xc6   :  { %v238_v33 = vsel %vm237_vm11, %v230_v27, %v229_v25  ;;  %v176_v34 = vadd.f32 %v175_v28, %v174_v21  ;;  %v180_v38 = vadd.f32 %v179_v30, %v178_v24 }
  0xc7   :  { %v170_v35 = vadd.f32 %v169_v1, %v168_v22  ;;  %v240_v37 = vsel %vm239_vm12, %v231_v31, %v238_v33  ;;  %v187_v42 = vrot.slane %v186_v36, 1 }
  0xc8   :  { %v202_v40 = vpack.c.bf16 %v176_v34, %v176_v34  ;;  %v181_v43 = vrot.slane %v180_v38, 1  ;;  %v242_v46 = vsel %vm241_vm13, %v232_v39, %v240_v37 }
  0xc9   :  { %v201_v41 = vpack.c.bf16 %v170_v35, %v170_v35  ;;  %v188_v45 = vadd.f32 %v187_v42, %v186_v36 }
  0xca   :  { %v182_v47 = vadd.f32 %v181_v43, %v180_v38  ;;  %v234_v48 = vunpack.c.l.b16 %v202_v40 }
  0xcb   :  { %v233_v44 = vunpack.c.l.b16 %v201_v41  ;;  %v204_v49 = vpack.c.bf16 %v188_v45, %v188_v45 }
  0xcc   :  { %v203_v50 = vpack.c.bf16 %v182_v47, %v182_v47 }
  0xcd   :  { %v244_v51 = vsel %vm243_vm14, %v233_v44, %v242_v46  ;;  %v236_v52 = vunpack.c.l.b16 %v204_v49 }
  0xce   :  { %v235_v53 = vunpack.c.l.b16 %v203_v50  ;;  %v246_v54 = vsel %vm245_vm15, %v234_v48, %v244_v51 }
  0xd0   :  { %v248_v55 = vsel %vm247_vm0, %v235_v53, %v246_v54 }
  0xd1   :  { %v250_v56 = vsel %vm249_vm1, %v236_v52, %v248_v55 }
  0xd2   :  { %v251_v57 = vpack.c.b16 %v250_v56, %v250_v56 }
  0xd4   :  { %425 = vmatmul.mubr.bf16.vlgmr.msra.gmra.mrb[0].mxu0 %v251_v57 }
  0xf5   :  { %v194_v58 = vpop.xlane.xlu0 %193 }
  0xf6   :  { %v195_v59 = vmax.f32 %v194_v58, 1.0 }
  0xf8   :  { %447 = vrcp.f32 %v195_v59 }
 0x102   :  { %v448_v60 = vpop.eup %447 }
 0x1a7   :  { %v335_v61 = vpop.f32.mrb[0].mxu0 }
 0x1a8   :  { %v341_v63 = vmul.f32 %v448_v60, %v335_v61  ;;  %v426_v0 = vpop.f32.mrb[1].mxu0 }
 0x1a9   :  { %v338_v2 = vpop.f32.mrb[2].mxu0 }
 0x1aa   :  { %v427_v3 = vpop.f32.mrb[3].mxu0  ;;  %v349_v4 = vadd.f32 %v398_v62, %v341_v63 }
 0x1ac   :  { %350 = vmax.xlane.f32.xlu1 %v349_v4 }
 0x239   :  { %v351_v5 = vpop.xlane.xlu1 %350 }
 0x23a   :  { %v352_v6 = vsub.f32 %v349_v4, %v351_v5 }
 0x23c   :  { %v353_v7 = vmul.f32 1.442695, %v352_v6 }
 0x23e   :  { %449 = vpow2.f32 %v353_v7 }
 0x248   :  { %v450_v8 = vpop.eup %449 }
 0x249   :  { %355 = vadd.xlane.f32.xlu0 %v450_v8 }
 0x2d6   :  { %v356_v9 = vpop.xlane.xlu0 %355 }
 0x2d7   :  { %451 = vrcp.f32 %v356_v9 }
 0x2e1   :  { %v452_v11 = vpop.eup %451 }
 0x2e2   :  { %v358_v12 = vmul.f32 %v452_v11, %v450_v8 }
 0x2e4   :  { %360 = vrot.lane.b32.xlu0 %v358_v12, %s533_s3 }
 0x356   :  { %v361_v13 = vpop.permute.xlu0 %360 }
 0x357   :  { %v363_v14 = vadd.f32 %v361_v13, %v358_v12 }
 0x359   :  { %v364_v15 = vmax.f32 %v363_v14, 1e-20 }
 0x35b   :  { %453 = vrcp.f32 %v364_v15 }
 0x365   :  { %v454_v16 = vpop.eup %453 }
 0x366   :  { %v366_v17 = vmul.f32 %v454_v16, %v358_v12 }
 0x368   :  { %370 = vperm.xlu1 %437, %v366_v17  }
 0x3e7   :  { %v371_v18 = vpop.permute.xlu1 %370 }
 0x3e8   :  { %v373_v19 = vsel %vm367_vm2, %v371_v18, %v358_v12 }
 0x3e9   :  { %374 = vst [vmem:[%s636_s4] sm:$0xff] %v373_v19 }
 0x3ea   :  { %379 = vsyncpa [#allocation3], 1 }
 0x3eb   :  { %380 = vsyncpa [#allocation5], 1 }

</bundles_post_ra>
